<compile_context>
chip_gen: v7x
topology: tpu7x:2x2x1
jax: 0.10.0
libtpu: 0.0.40
codegen_flags: <defaults>
</compile_context>

<pallas_src>
import jax
import jax.numpy as jnp
from jax.experimental import pallas as pl
from jax.experimental.pallas import tpu as pltpu


_TARGET_GT_BLOCK_BYTES = 2 << 20   # ~2 MiB of streamed gt per grid step
_MAX_LANE_TILE = 32768             # f32 lanes per spatial tile (multiple of 128)
_MAX_N_BLK = 8                     # batch rows per output block (sublane-dense)


def _encoder_kernel(mask_ref, gt_ref, meas_ref):
    # mask_ref: (B, T)   gt_ref: (n_blk, B, T)   meas_ref: (n_blk, T)
    mask = mask_ref[...]
    n_blk = gt_ref.shape[0]
    # Static per-row loop: keeps only one (B, T) slab live at a time so large
    # tiles do not create vreg spill traffic (reduction runs on VPU/XLU; the
    # MXU is unused -- this is a diagonal contraction, not a matmul).
    for n in range(n_blk):
        prod = mask * gt_ref[n]                               # (B, T)
        meas = jnp.sum(prod, axis=0, keepdims=True)           # (1, T)  sum over B
        meas = jnp.clip(meas, 0.0, 1.0)                       # torch.clamp(meas, 0, 1)
        meas = jnp.round(meas * 255.0) / 255.0                # quantizer: round(x*255)/255
        meas_ref[pl.ds(n, 1), :] = meas.astype(meas_ref.dtype)


def _pick_tiles(N, B, HW):
    """Choose (n_blk, t_tile) so the gt block is ~2 MiB and blocks are legal."""
    n_blk = min(N, _MAX_N_BLK)
    if HW <= 128:
        t_tile = HW                      # full extent: always legal
    else:
        t_target = _TARGET_GT_BLOCK_BYTES // (n_blk * B * 4)
        t_tile = min(_MAX_LANE_TILE, max(128, t_target))
        t_tile = (t_tile // 128) * 128   # keep lane dim a multiple of 128
        if HW <= t_tile:
            t_tile = HW                  # full extent (single spatial block)
    num_t = pl.cdiv(HW, t_tile)
    num_n = pl.cdiv(N, n_blk)
    # Keep >= 2 grid steps when possible so both v7x TensorCores get work.
    if num_t * num_n == 1 and HW >= 256 and HW % 256 == 0:
        t_tile = HW // 2
        if t_tile % 128 != 0:
            t_tile = HW                  # fall back to a single full block
    return n_blk, t_tile


def encoder_forward(gt_batch, mask):
    """Pallas implementation of encoder.forward.

    gt_batch: (N, B, H, W) float32
    mask:     (B, H, W)    float32
    returns (meas_batch (N, H, W) float32, mask)
    """
    N, B, H, W = gt_batch.shape
    assert mask.shape == (B, H, W)
    HW = H * W

    # Lane-dense layout: flatten spatial dims so the last (lane) dim of every
    # block is a large multiple of 128 (or the full extent).
    gt_flat = gt_batch.reshape(N, B, HW)
    mask_flat = mask.reshape(B, HW)

    n_blk, t_tile = _pick_tiles(N, B, HW)
    num_t = pl.cdiv(HW, t_tile)
    num_n = pl.cdiv(N, n_blk)

    # Double-buffered footprint (gt + mask + out blocks), used to size the
    # scoped-VMEM limit safely on v5e (16 MiB default) through v7x (64 MiB
    # physical); with default tile targets this stays around ~5 MiB.
    block_bytes = 4 * (n_blk * B * t_tile + B * t_tile + n_blk * t_tile)
    vmem_limit = int(min(max(2.5 * block_bytes, 16 << 20), 40 << 20))

    cost = pl.CostEstimate(
        flops=2 * N * B * HW,
        transcendentals=0,
        bytes_accessed=4 * (N * B * HW + B * HW + N * HW),
    )

    meas_flat = pl.pallas_call(
        _encoder_kernel,
        out_shape=jax.ShapeDtypeStruct((N, HW), jnp.float32),
        # N-blocks innermost so the mask block index stays constant across the
        # batch loop and Pallas skips re-fetching it (mask traffic = B*HW).
        grid=(num_t, num_n),
        in_specs=[
            # mask: depends only on the spatial tile -> resident across N-blocks
            pl.BlockSpec((B, t_tile), lambda t, n: (0, t)),
            # gt: n_blk batch rows x one spatial tile
            pl.BlockSpec((n_blk, B, t_tile), lambda t, n: (n, 0, t)),
        ],
        out_specs=pl.BlockSpec((n_blk, t_tile), lambda t, n: (n, t)),
        compiler_params=pltpu.CompilerParams(
            dimension_semantics=("parallel", "parallel"),
            vmem_limit_bytes=vmem_limit,
        ),
        cost_estimate=cost,
    )(mask_flat, gt_flat)

    return meas_flat.reshape(N, H, W), mask


def make_weight(key, B, H, W, gray_levels):
    """Deterministic parameter init mirroring reset_parameters():
    uniform(0,1) then discretized to `gray_levels` levels."""
    w = jax.random.uniform(key, (B, H, W), dtype=jnp.float32, minval=0.0, maxval=1.0)
    w = jnp.round(w * (gray_levels - 1)) / (gray_levels - 1)
    return w


if __name__ == "__main__":
    # small shapes consistent with the module's forward
    N, B, H, W = 2, 8, 16, 16
    gray_levels = 8

    key = jax.random.PRNGKey(0)
    k_w, k_x = jax.random.split(key)

    # parameter (the mask for train_type='sim', gray_levels > 2)
    mask = make_weight(k_w, B, H, W, gray_levels)

    # input batch
    gt_batch = jax.random.uniform(k_x, (N, B, H, W), dtype=jnp.float32)

    meas_batch, mask_out = encoder_forward(gt_batch, mask)
    meas_batch = jax.block_until_ready(meas_batch)

    # reference check in plain JAX
    ref = jnp.sum(mask[None] * gt_batch, axis=1)
    ref = jnp.clip(ref, 0.0, 1.0)
    ref = jnp.round(ref * 255.0) / 255.0
    assert meas_batch.shape == (N, H, W)
    assert jnp.allclose(meas_batch, ref, atol=1e-6), "mismatch vs reference"

    print("KERNEL_OK")
</pallas_src>

<mosaic_0001>
module attributes {stable_mosaic.version = 11 : i64} {
  func.func @_encoder_kernel(%arg0: i32, %arg1: i32, %arg2: memref<8x128xf32, #tpu.memory_space<vmem>>, %arg3: memref<2x8x128xf32, #tpu.memory_space<vmem>>, %arg4: memref<2x128xf32, #tpu.memory_space<vmem>>) attributes {dimension_semantics = [#tpu.dimension_semantics<parallel>, #tpu.dimension_semantics<parallel>], iteration_bounds = array<i64: 2, 1>, scalar_prefetch = 0 : i64, scratch_operands = 0 : i64, tpu.core_type = #tpu.core_type<tc>, window_params = [{transform_indices = @transform_0, window_bounds = array<i64: 8, 128>}, {transform_indices = @transform_1, window_bounds = array<i64: 2, 8, 128>}, {transform_indices = @transform_2, window_bounds = array<i64: 2, 128>}]} {
    %c0 = arith.constant 0 : index
    %c0_0 = arith.constant 0 : index
    %0 = vector.load %arg2[%c0, %c0_0] : memref<8x128xf32, #tpu.memory_space<vmem>>, vector<8x128xf32>
    %c0_1 = arith.constant 0 : index
    %c0_2 = arith.constant 0 : index
    %c0_3 = arith.constant 0 : index
    %1 = vector.load %arg3[%c0_1, %c0_2, %c0_3] : memref<2x8x128xf32, #tpu.memory_space<vmem>>, vector<1x8x128xf32>
    %2 = vector.shape_cast %1 : vector<1x8x128xf32> to vector<8x128xf32>
    %3 = arith.mulf %0, %2 : vector<8x128xf32>
    %cst = arith.constant dense<0.000000e+00> : vector<128xf32>
    %4 = vector.multi_reduction <add>, %3, %cst [0] : vector<8x128xf32> to vector<128xf32>
    %5 = vector.shape_cast %4 : vector<128xf32> to vector<1x128xf32>
    %cst_4 = arith.constant 0.000000e+00 : f32
    %cst_5 = arith.constant 1.000000e+00 : f32
    %6 = vector.broadcast %cst_4 : f32 to vector<1x128xf32>
    %7 = arith.maximumf %6, %5 : vector<1x128xf32>
    %8 = vector.broadcast %cst_5 : f32 to vector<1x128xf32>
    %9 = arith.minimumf %8, %7 : vector<1x128xf32>
    %cst_6 = arith.constant 2.550000e+02 : f32
    %10 = vector.broadcast %cst_6 : f32 to vector<1x128xf32>
    %11 = arith.mulf %9, %10 : vector<1x128xf32>
    %12 = math.roundeven %11 : vector<1x128xf32>
    %cst_7 = arith.constant 2.550000e+02 : f32
    %13 = vector.broadcast %cst_7 : f32 to vector<1x128xf32>
    %14 = arith.divf %12, %13 : vector<1x128xf32>
    %c0_8 = arith.constant 0 : index
    %c0_9 = arith.constant 0 : index
    %15 = vector.load %arg4[%c0_8, %c0_9] : memref<2x128xf32, #tpu.memory_space<vmem>>, vector<1x128xf32>
    tpu.vector_store %arg4[%c0_8, %c0_9], %14 {strides = array<i32>} : memref<2x128xf32, #tpu.memory_space<vmem>>, vector<1x128xf32>,
    %c1 = arith.constant 1 : index
    %c0_10 = arith.constant 0 : index
    %c0_11 = arith.constant 0 : index
    %16 = vector.load %arg3[%c1, %c0_10, %c0_11] : memref<2x8x128xf32, #tpu.memory_space<vmem>>, vector<1x8x128xf32>
    %17 = vector.shape_cast %16 : vector<1x8x128xf32> to vector<8x128xf32>
    %18 = arith.mulf %0, %17 : vector<8x128xf32>
    %cst_12 = arith.constant dense<0.000000e+00> : vector<128xf32>
    %19 = vector.multi_reduction <add>, %18, %cst_12 [0] : vector<8x128xf32> to vector<128xf32>
    %20 = vector.shape_cast %19 : vector<128xf32> to vector<1x128xf32>
    %cst_13 = arith.constant 0.000000e+00 : f32
    %cst_14 = arith.constant 1.000000e+00 : f32
    %21 = vector.broadcast %cst_13 : f32 to vector<1x128xf32>
    %22 = arith.maximumf %21, %20 : vector<1x128xf32>
    %23 = vector.broadcast %cst_14 : f32 to vector<1x128xf32>
    %24 = arith.minimumf %23, %22 : vector<1x128xf32>
    %cst_15 = arith.constant 2.550000e+02 : f32
    %25 = vector.broadcast %cst_15 : f32 to vector<1x128xf32>
    %26 = arith.mulf %24, %25 : vector<1x128xf32>
    %27 = math.roundeven %26 : vector<1x128xf32>
    %cst_16 = arith.constant 2.550000e+02 : f32
    %28 = vector.broadcast %cst_16 : f32 to vector<1x128xf32>
    %29 = arith.divf %27, %28 : vector<1x128xf32>
    %c1_17 = arith.constant 1 : index
    %c0_18 = arith.constant 0 : index
    %30 = vector.load %arg4[%c1_17, %c0_18] : memref<2x128xf32, #tpu.memory_space<vmem>>, vector<1x128xf32>
    tpu.vector_store %arg4[%c1_17, %c0_18], %29 {strides = array<i32>} : memref<2x128xf32, #tpu.memory_space<vmem>>, vector<1x128xf32>,
    return
  }
  func.func @transform_0(%arg0: i32, %arg1: i32) -> (i32, i32) {
    %c0_i32 = arith.constant 0 : i32
    %c0_i32_0 = arith.constant 0 : i32
    return %c0_i32, %arg0 : i32, i32
  }
  func.func @transform_1(%arg0: i32, %arg1: i32) -> (i32, i32, i32) {
    %c0_i32 = arith.constant 0 : i32
    %c0_i32_0 = arith.constant 0 : i32
    return %arg1, %c0_i32, %arg0 : i32, i32, i32
  }
  func.func @transform_2(%arg0: i32, %arg1: i32) -> (i32, i32) {
    %c0_i32 = arith.constant 0 : i32
    return %arg1, %arg0 : i32, i32
  }
}

</mosaic_0001>

<bundles_post_ra>
// kernel: tpu_custom_call.1
= control target key start
LH: loop header
LB: loop body
LE: loop exit
PB: predicated region body
PF: predicated region fallthrough
CT: control target
= control target key end

     0   :  { %7 = vsyncpa [#allocation3], 0  ;;  %s853_s0 = inlined_call_operand.hbm [shape: f32[8,256], index: 0, kind: input, shape index: {}]   ;;  %s854_s1 = inlined_call_operand.hbm [shape: f32[2,8,256], index: 1, kind: input, shape index: {}]   ;;  %s855_s2 = inlined_call_operand.hbm [shape: f32[2,256], index: 2, kind: output, shape index: {}]  }
   0x1   :  { %9 = vsyncpa [#allocation3 + $0x1], 0 }
   0x2   :  { %10 = vsyncpa [#allocation6], 0 }
   0x3   :  { %12 = vsyncpa [#allocation6 + $0x1], 0 }
   0x4   :  { %13 = vsyncpa [#allocation4], 0 }
   0x5   :  { %15 = vsyncpa [#allocation4 + $0x1], 0  ;;  %s628_s9 = smov 0   ;;  %s630_s10 = smov 0  }
   0x6   :  { %s632_s11 = smov 0   ;;  %s634_s12 = smov 0  }
   0x7   :  { %s636_s13 = smov 0   ;;  %s638_s14 = smov 0  }
   0x8 LB: > { %s370_s15 = sadd.s32 4294967295, %s605_s14   ;;  %s371_s16 = sadd.s32 4294967294, %s605_s14   ;;  %s605_s14 = sphi %s638_s14, %s21_s14   ;;  %s601_s13 = sphi %s636_s13, %s872_s13   ;;  %s597_s12 = sphi %s634_s12, %s871_s12   ;;  %s593_s11 = sphi %s632_s11, %s870_s11   ;;  %s589_s10 = sphi %s630_s10, %s869_s10   ;;  %s585_s9 = sphi %s628_s9, %s868_s9  }
   0x9   : > { %s33_s17 = sadd.s32 1, %s601_s13  ;;  %s40_s18 = sadd.s32 1, %s593_s11 }
   0xa   : > { %p35_p0 = scmp.ge.s32.totalorder %s33_s17, 2  ;;  %p47_p1 = scmp.ne.s32.totalorder %s593_s11, %s589_s10 }
   0xb   : > { %p48_p2 = scmp.eq.s32.totalorder %s605_s14, 0  ;;  %p53_p3 = scmp.ne.s32.totalorder %s589_s10, %s585_s9 }
   0xc   : > { %s874_s17 = smov (%p35_p0, %s33_s17), 0  ;;  %p54_p5 = scmp.eq.s32.totalorder %s370_s15, 0 }
   0xd   : > { %p669_p4 = por %p48_p2, %p47_p1  ;;  %s37_s20 = ssub.s32 %s601_s13, %s874_s17 }
   0xe   : > { %p107_p6 = scmp.eq.s32.totalorder %s370_s15, 1  ;;  %p38_p7 = scmp.eq.s32.totalorder %s37_s20, 0 }
   0xf   : > { %p675_p8 = por %p54_p5, %p53_p3  ;;  %p113_p10 = scmp.eq.s32.totalorder %s371_s16, 1 }
  0x10   : > { %p679_p9 = por %p107_p6, %p47_p1  ;;  %p406_p13 = scmp.lt.s32.totalorder %s605_s14, 2 }
  0x11   : > { %s859_s21 = scalar_select %p675_p8, 1, 0 }
  0x12   : > { %s860_s22 = scalar_select %p679_p9, 1, 0 }
  0x13   : > { %s684_s23 = scalar_select %p38_p7, %s593_s11, %s40_s18  }
  0x14   : > { %p686_p11 = por %p113_p10, %p53_p3  ;;  %s693_s25 = sand.u32 1, %s593_s11  }
  0x15   : > { %s374_s26 = sshll.u32 %s693_s25, 3  ;;  %s375_s27 = sshll.u32 %s601_s13, 7 }
  0x16   : > { %s861_s24 = scalar_select %p686_p11, 1, 0 }
  0x17   : > { %s702_s30 = scalar_lea.hbm %s853_s0, %s375_s27  ;;  %s137_s3 = scalar_lea.vmem [#allocation2], %s374_s26 }
  0x18   : > { %s144_s4 = sshll.u32 %s137_s3, 4  ;;  %p708_p0 = pnand %p406_p13, %p669_p4  ;;  %s704_s4 = int_to_ptr.vmem [resolvable:$true] %s144_s4 }
  0x19   : > { %s376_s6 = sshll.u32 %s693_s25, 4  ;;  %s134_s7 = scalar_lea.sflag [#allocation3], %s693_s25 }
  0x1a   : > { %s459_s8 = scalar_lea.hbm %s702_s30, 128  ;;  %p461_p2 = pneg %p708_p0 }
  0x1b   : > { %p460_p1 = scmp.ne.s32.totalorder %s702_s30, %s459_s8  ;;  %s464_s18 = scalar_lea.hbm %s853_s0, 256 }
  0x1c   : > { %p465_p4 = scmp.lt.u32.totalorder %s702_s30, %s853_s0  ;;  %p466_p6 = scmp.lt.u32.totalorder %s464_s18, %s459_s8 }
  0x1d   : > { %p462_p3 = pnand %p461_p2, %p460_p1  ;;  %p468_p10 = scmp.lt.u32.totalorder %s459_s8, %s702_s30 }
  0x1e   : > { %p467_p7 = por %p466_p6, %p465_p4 }
  0x1f   : > { %p463_p5 = pneg %p462_p3 }
  0x20   : > { %p469_p13 = por %p468_p10, %p467_p7 }
  0x22   : > { %p470_p12 = pnand %p469_p13, %p463_p5 }
  0x24   : > { %473 = shalt.err (!%p470_p12)
}
  0x25   : > { %s474_s26 = scalar_lea.vmem %s704_s4, 128  ;;  %s607_s28 = smov [#allocation2]  }
  0x26   : > { %p475_p1 = scmp.ne.s32.totalorder %s704_s4, %s474_s26  ;;  %s479_s29 = sshll.u32 %s607_s28, 4  ;;  %s480_s29 = int_to_ptr.vmem [resolvable:$false] %s479_s29 }
  0x27   : > { %s481_s3 = scalar_lea.vmem %s480_s29, 256  ;;  %p482_p9 = scmp.lt.s32.totalorder %s704_s4, %s480_s29 }
  0x28   : > { %p477_p3 = pnand %p475_p1, %p461_p2  ;;  %p483_p4 = scmp.lt.s32.totalorder %s481_s3, %s474_s26 }
  0x2a   : > { %p478_p11 = pneg %p477_p3  ;;  %p484_p6 = por %p483_p4, %p482_p9 }
  0x2c   : > { %p485_p7 = pnand %p484_p6, %p478_p11 }
  0x2e   : > { %488 = shalt.err (!%p485_p7)
}
  0x2f   : > { %398 = dma.hbm_to_vmem [thread:$0]  (!%p708_p0), %s702_s30, 128, %s704_s4, %s134_s7  }
  0x30   : > { %s744_s16 = scalar_lea.hbm %s854_s1, %s375_s27  ;;  %p378_p9 = scmp.ge.s32.totalorder %s605_s14, 1 }
  0x31   : > { %p172_p11 = scmp.lt.s32.totalorder %s605_s14, 3  ;;  %s155_s18 = scalar_lea.vmem [#allocation5], %s376_s6 }
  0x32   : > { %s164_s19 = sshll.u32 %s155_s18, 4  ;;  %s152_s30 = scalar_lea.sflag [#allocation6], %s693_s25  ;;  %s750_s19 = int_to_ptr.vmem [resolvable:$true] %s164_s19 }
  0x33   : > { %p752_p12 = pnand %p378_p9, %p172_p11  ;;  %s489_s4 = scalar_lea.hbm %s744_s16, 256 }
  0x34   : > { %p490_p5 = scmp.ne.s32.totalorder %s744_s16, %s489_s4  ;;  %s494_s26 = scalar_lea.hbm %s854_s1, 512 }
  0x35   : > { %p495_p1 = scmp.lt.u32.totalorder %s744_s16, %s854_s1  ;;  %p496_p3 = scmp.lt.u32.totalorder %s494_s26, %s489_s4 }
  0x36   : > { %p492_p10 = pnand %p490_p5, %p461_p2  ;;  %p498_p6 = scmp.lt.u32.totalorder %s489_s4, %s744_s16 }
  0x37   : > { %p497_p4 = por %p496_p3, %p495_p1 }
  0x38   : > { %p493_p13 = pneg %p492_p10 }
  0x39   : > { %p499_p7 = por %p498_p6, %p497_p4 }
  0x3b   : > { %p500_p9 = pnand %p499_p7, %p493_p13 }
  0x3d   : > { %503 = shalt.err (!%p500_p9)
}
  0x3e   : > { %s504_s29 = scalar_lea.vmem %s750_s19, 256  ;;  %s608_s3 = smov [#allocation5]  }
  0x3f   : > { %p505_p11 = scmp.ne.s32.totalorder %s750_s19, %s504_s29  ;;  %s509_s8 = sshll.u32 %s608_s3, 4  ;;  %s510_s8 = int_to_ptr.vmem [resolvable:$false] %s509_s8 }
  0x40   : > { %s511_s15 = scalar_lea.vmem %s510_s8, 512  ;;  %p512_p8 = scmp.lt.s32.totalorder %s750_s19, %s510_s8 }
  0x41   : > { %p507_p5 = pnand %p505_p11, %p461_p2  ;;  %p513_p1 = scmp.lt.s32.totalorder %s511_s15, %s504_s29 }
  0x43   : > { %p508_p10 = pneg %p507_p5  ;;  %p514_p3 = por %p513_p1, %p512_p8 }
  0x45   : > { %p515_p4 = pnand %p514_p3, %p508_p10 }
  0x47   : > { %518 = shalt.err (!%p515_p4)
}
  0x48   : > { %s609_s18 = smov 256   ;;  %s610_s4 = smov 128  }
  0x49   : > { %s611_s27 = smov 8   ;;  %176 = sbr.rel (%p752_p12) target bundleno = 124 (0x7c), region = 28 }
  0x4a   : > { %401 = dma.hbm_to_vmem [thread:$0]  (!%p708_p0), %s744_s16, 256, %s750_s19, %s152_s30, %s609_s18, %s610_s4, %s611_s27  }
  0x4b   : > { %s785_s7 = sand.u32 (!%p752_p12), 1, %s589_s10   ;;  %p864_p8 = scmp.ne.s32.totalorder (!%p752_p12), %s859_s21, 0 }
  0x4c   : > { %s379_s26 = sshll.u32 (!%p752_p12), %s785_s7, 3  ;;  %s179_s28 = scalar_lea.sflag (!%p752_p12), [#allocation3], %s785_s7 }
  0x4d   : > { %s182_s6 = scalar_lea.vmem (!%p752_p12), [#allocation2], %s379_s26 }
  0x50   : > { %572 = dma.done.wait (%p864_p8), %s179_s28, 128  }
  0x51   : > { %574 = vsyncadd (%p864_p8), %s179_s28, 4294967168  ;;  %s380_s25 = sshll.u32 %s785_s7, 4  ;;  %s188_s5 = scalar_lea.sflag [#allocation6], %s785_s7 }
  0x52   : > { %s191_s16 = scalar_lea.vmem [#allocation5], %s380_s25 }
  0x53   : > { %576 = dma.done.wait (%p864_p8), %s188_s5, 256  }
  0x54   : > { %578 = vsyncadd (%p864_p8), %s188_s5, 4294967040  ;;  %v218_v0 = vld [vmem:[%s182_s6] sm:$0xff]  ;;  %v219_v1 = vld [vmem:[%s191_s16] sm:$0xff]  ;;  %s381_s21 = sshll.u32 %s785_s7, 1  ;;  %s384_s30 = sshll.u32 %s597_s12, 5 }
  0x55   : > { %v382_v2 = vld [vmem:[%s191_s16 + $0x8] sm:$0xff]  ;;  %v220_v3 = vmul.f32 %v219_v1, %v218_v0  ;;  %s216_s19 = scalar_lea.vmem [#allocation7], %s381_s21  ;;  %s806_s8 = scalar_lea.hbm %s855_s2, %s384_s30 }
  0x56   : > { %v236_v4 = vmul.f32 %v382_v2, %v218_v0  ;;  %s265_s20 = sshll.u32 %s216_s19, 4  ;;  %s250_s15 = scalar_lea.sflag [#allocation4], %s785_s7  ;;  %s801_s20 = int_to_ptr.vmem [resolvable:$true] %s265_s20 }
  0x57   : > { %v221_v5 = vrot.slane %v220_v3, 4  ;;  %s519_s18 = scalar_lea.vmem %s801_s20, 32  ;;  %p865_p2 = scmp.ne.s32.totalorder %s860_s22, 0 }
  0x58   : > { %v237_v6 = vrot.slane %v236_v4, 4  ;;  %p520_p0 = scmp.ne.s32.totalorder %s801_s20, %s519_s18  ;;  %s612_s12 = smov [#allocation7]  }
  0x59   : > { %v222_v7 = vadd.f32 %v221_v5, %v220_v3  ;;  %s523_s4 = sshll.u32 %s612_s12, 4  ;;  %s524_s4 = int_to_ptr.vmem [resolvable:$false] %s523_s4 }
  0x5a   : > { %v238_v8 = vadd.f32 %v237_v6, %v236_v4  ;;  %p521_p12 = pnand %p520_p0, %p865_p2  ;;  %s525_s27 = scalar_lea.vmem %s524_s4, 64 }
  0x5b   : > { %v223_v9 = vrot.slane %v222_v7, 2  ;;  %p526_p6 = scmp.lt.s32.totalorder %s801_s20, %s524_s4  ;;  %p527_p7 = scmp.lt.s32.totalorder %s525_s27, %s519_s18 }
  0x5c   : > { %v239_v10 = vrot.slane %v238_v8, 2  ;;  %p522_p13 = pneg %p521_p12 }
  0x5d   : > { %v224_v11 = vadd.f32 %v223_v9, %v222_v7  ;;  %p528_p9 = por %p527_p7, %p526_p6 }
  0x5e   : > { %v240_v12 = vadd.f32 %v239_v10, %v238_v8 }
  0x5f   : > { %v225_v13 = vrot.slane %v224_v11, 1  ;;  %p529_p11 = pnand %p528_p9, %p522_p13 }
  0x60   : > { %v241_v14 = vrot.slane %v240_v12, 1 }
  0x61   : > { %v226_v15 = vadd.f32 %v225_v13, %v224_v11 }
  0x62   : > { %v242_v16 = vadd.f32 %v241_v14, %v240_v12 }
  0x63   : > { %v227_v17 = vmax.f32 %v226_v15, 0.0 }
  0x64   : > { %v243_v18 = vmax.f32 %v242_v16, 0.0 }
  0x65   : > { %v228_v19 = vmin.f32 %v227_v17, 1.0 }
  0x66   : > { %v244_v20 = vmin.f32 %v243_v18, 1.0 }
  0x67   : > { %v229_v21 = vmul.f32 255.0, %v228_v19 }
  0x68   : > { %v245_v22 = vmul.f32 255.0, %v244_v20 }
  0x69   : > { %v387_v23 = vround.rtne.f32 %v229_v21 }
  0x6a   : > { %v388_v24 = vround.rtne.f32 %v245_v22 }
  0x6b   : > { %v232_v25 = vmul.f32 0.003921569, %v387_v23 }
  0x6c   : > { %v247_v26 = vmul.f32 0.003921569, %v388_v24 }
  0x6d   : > { %233 = vst [vmem:[%s216_s19] sm:$0x1] %v232_v25 }
  0x6e   : > { %248 = vst [vmem:[%s216_s19 + $0x1] sm:$0x1] %v247_v26 }
  0x6f   : > { %532 = shalt.err (!%p529_p11)
}
  0x70   : > { %s533_s7 = scalar_lea.hbm %s806_s8, 32  ;;  %s537_s6 = scalar_lea.hbm %s855_s2, 64 }
  0x71   : > { %p534_p5 = scmp.ne.s32.totalorder %s806_s8, %s533_s7  ;;  %p538_p3 = scmp.lt.u32.totalorder %s806_s8, %s855_s2 }
  0x72   : > { %p539_p4 = scmp.lt.u32.totalorder %s537_s6, %s533_s7  ;;  %p541_p0 = scmp.lt.u32.totalorder %s533_s7, %s806_s8 }
  0x73   : > { %p535_p10 = pnand %p534_p5, %p865_p2 }
  0x74   : > { %p540_p8 = por %p539_p4, %p538_p3 }
  0x75   : > { %p536_p1 = pneg %p535_p10 }
  0x76   : > { %p542_p12 = por %p541_p0, %p540_p8 }
  0x78   : > { %p543_p13 = pnand %p542_p12, %p536_p1 }
  0x7a   : > { %546 = shalt.err (!%p543_p13)
}
  0x7b   : > { %393 = dma.vmem_to_hbm [thread:$0]  (%p865_p2), %s801_s20, 32, %s806_s8, %s250_s15  }
  0x7c PF: > { %s277_s16 = sand.u32 1, %s585_s9   ;;  %p866_p6 = scmp.ne.s32.totalorder %s861_s24, 0 }
  0x7d   : > { %p867_p7 = scmp.ge.s32.totalorder %s605_s14, 2  ;;  %s278_s21 = scalar_lea.sflag [#allocation4], %s277_s16 }
  0x7f   : > { %p403_p9 = pnand %p867_p7, %p866_p6 }
  0x81   : > { %580 = dma.done.wait (!%p403_p9), %s278_s21, 32  }
  0x82   : > { %582 = vsyncadd (!%p403_p9), %s278_s21, 4294967264  ;;  %s21_s14 = sadd.s32 1, %s605_s14   ;;  %s868_s9 = smov %s589_s10 }
  0x83   : > { %p18_p11 = scmp.ge.s32.totalorder %s21_s14, 4   ;;  %s869_s10 = smov %s593_s11 }
  0x84   : > { %s870_s11 = smov %s684_s23  ;;  %s871_s12 = smov %s601_s13 }
  0x85   : > { %s872_s13 = smov %s874_s17  ;;  %20 = sbr.rel (!%p18_p11) target bundleno = 8 (0x8), region = 87 }
  0x8c   :  { %283 = vsyncpa [#allocation3], 1 }
  0x8d   :  { %285 = vsyncpa [#allocation3 + $0x1], 1 }
  0x8e   :  { %286 = vsyncpa [#allocation6], 1 }
  0x8f   :  { %288 = vsyncpa [#allocation6 + $0x1], 1 }
  0x90   :  { %289 = vsyncpa [#allocation4], 1 }
  0x91   :  { %291 = vsyncpa [#allocation4 + $0x1], 1 }

</bundles_post_ra>
